<compile_context>
chip_gen: v5e
topology: v5e:2x2
jax: 0.10.0
libtpu: 0.0.40
codegen_flags: <defaults>
</compile_context>

<pallas_src>
import functools

import jax
import jax.numpy as jnp
from jax import lax
from jax.experimental import pallas as pl
from jax.experimental.pallas import tpu as pltpu

EPS = 1e-5  # nn.InstanceNorm2d default


def _pick_cout_tile(cout):
    # Full Cout per step when small; otherwise the largest multiple-of-8
    # divisor <= 256 (bounds the per-step VMEM footprint of the phase planes).
    if cout <= 256:
        return cout
    for d in range(256, 7, -8):
        if cout % d == 0:
            return d
    return cout


def _convt_norm_relu_kernel(x_ref, wt_ref, b_ref, o_ref, *, H, W):
    """One (sample, Cout-tile) grid step.

    x_ref : (Cin, H*W)    bf16  input sample, spatial flattened onto lanes
    wt_ref: (9, Ct, Cin)  bf16  per-tap weights, wt[kh*3+kw, co, ci] = W[ci, co, kh, kw]
    b_ref : (Ct, 1)       f32   conv bias
    o_ref : (4, Ct, H*W)  f32   output phases t = (oy%2)*2 + (ox%2), after norm + ReLU
    """
    cin = x_ref.shape[0]
    hw = H * W

    x = x_ref[...]                                          # (Cin, HW) bf16

    def shift_left(v, k):
        # out[:, p] = v[:, p + k], zero fill past the end.
        return jnp.concatenate(
            [v[:, k:], jnp.zeros((cin, k), dtype=v.dtype)], axis=1)

    # lane p = i*W + j ; +1 lane shifts must not leak across row boundaries.
    lane = lax.broadcasted_iota(jnp.int32, (1, hw), 1)
    col_ok = (lane % W) != (W - 1)
    zero = jnp.zeros((), dtype=x.dtype)

    x01 = jnp.where(col_ok, shift_left(x, 1), zero)         # x[i, j+1]
    x10 = shift_left(x, W)                                  # x[i+1, j]
    x11 = jnp.where(col_ok, shift_left(x, W + 1), zero)     # x[i+1, j+1]

    def mm(t, rhs):                                         # (Ct,Cin)@(Cin,HW) on MXU
        return jnp.dot(wt_ref[t], rhs, preferred_element_type=jnp.float32)

    b = b_ref[...]                                          # (Ct, 1) f32
    # ConvTranspose2d(s=2, p=1, op=1, K=3) sub-pixel phases, tap index t = kh*3 + kw.
    y00 = mm(4, x) + b                                      # W[1,1]
    y01 = mm(5, x) + mm(3, x01) + b                         # W[1,2], W[1,0]
    y10 = mm(7, x) + mm(1, x10) + b                         # W[2,1], W[0,1]
    y11 = mm(8, x) + mm(6, x01) + mm(2, x10) + mm(0, x11) + b
    #                                                       # W[2,2], W[2,0], W[0,2], W[0,0]

    # InstanceNorm2d over the full spatial extent (all 4 phases), f32 math.
    n_tot = 4.0 * hw
    mean = (jnp.sum(y00, axis=1, keepdims=True)
            + jnp.sum(y01, axis=1, keepdims=True)
            + jnp.sum(y10, axis=1, keepdims=True)
            + jnp.sum(y11, axis=1, keepdims=True)) / n_tot
    c00 = y00 - mean
    c01 = y01 - mean
    c10 = y10 - mean
    c11 = y11 - mean
    var = (jnp.sum(c00 * c00, axis=1, keepdims=True)
           + jnp.sum(c01 * c01, axis=1, keepdims=True)
           + jnp.sum(c10 * c10, axis=1, keepdims=True)
           + jnp.sum(c11 * c11, axis=1, keepdims=True)) / n_tot
    inv = lax.rsqrt(var + EPS)

    o_ref[0] = jnp.maximum(c00 * inv, 0.0).astype(o_ref.dtype)
    o_ref[1] = jnp.maximum(c01 * inv, 0.0).astype(o_ref.dtype)
    o_ref[2] = jnp.maximum(c10 * inv, 0.0).astype(o_ref.dtype)
    o_ref[3] = jnp.maximum(c11 * inv, 0.0).astype(o_ref.dtype)


def conv_t_norm_relu(x, weight, bias, *, stride=2, padding=1, output_padding=1):
    """ConvTranspose2d(k=3, s=2, p=1, op=1) + InstanceNorm2d + ReLU.

    x:      (N, Cin, H, W)    f32 NCHW
    weight: (Cin, Cout, 3, 3) PyTorch ConvTranspose2d layout
    bias:   (Cout,)
    returns (N, Cout, 2H, 2W) f32 NCHW
    """
    N, Cin, H, W = x.shape
    _, Cout, K, K2 = weight.shape
    assert (stride, padding, output_padding, K, K2) == (2, 1, 1, 3, 3), (
        "kernel specialized to ConvTranspose2d(k=3, s=2, p=1, op=1)")

    HW = H * W
    Hout, Wout = 2 * H, 2 * W

    ct = _pick_cout_tile(Cout)
    n_ct = Cout // ct

    # --- cheap XLA-side repacking (no im2col, no dilation) -------------------
    x_flat = x.reshape(N, Cin, HW).astype(jnp.bfloat16)
    # wt[t, co, ci] = weight[ci, co, kh, kw] with t = kh*3 + kw
    wt = jnp.transpose(weight, (2, 3, 1, 0)).reshape(K * K, Cout, Cin)
    wt = wt.astype(jnp.bfloat16)
    b2 = bias.reshape(Cout, 1).astype(jnp.float32)

    # --- explicit VMEM budget (2x double-buffered I/O + intermediates) -------
    x_blk = Cin * HW * 2
    wt_blk = K * K * ct * Cin * 2
    out_blk = 4 * ct * HW * 4
    inter = 8 * ct * HW * 4 + 3 * Cin * HW * 2
    vmem_limit = int(min(2 * (x_blk + out_blk) + wt_blk + ct * 4 + inter + (8 << 20),
                         100 << 20))

    kernel = functools.partial(_convt_norm_relu_kernel, H=H, W=W)

    out_ph = pl.pallas_call(
        kernel,
        out_shape=jax.ShapeDtypeStruct((N, 4, Cout, HW), jnp.float32),
        grid_spec=pltpu.PrefetchScalarGridSpec(
            num_scalar_prefetch=0,
            grid=(N, n_ct),
            in_specs=[
                pl.BlockSpec((None, Cin, HW), lambda n, c: (n, 0, 0)),
                pl.BlockSpec((K * K, ct, Cin), lambda n, c: (0, c, 0)),
                pl.BlockSpec((ct, 1), lambda n, c: (c, 0)),
            ],
            out_specs=pl.BlockSpec((None, 4, ct, HW), lambda n, c: (n, 0, c, 0)),
        ),
        compiler_params=pltpu.CompilerParams(
            dimension_semantics=("parallel", "parallel"),
            vmem_limit_bytes=vmem_limit),
    )(x_flat, wt, b2)

    # Interleave the 4 phases back to NCHW: out[n, c, 2i+ry, 2j+rx] = phase[ry*2+rx][c, i*W+j].
    out = out_ph.reshape(N, 2, 2, Cout, H, W)
    out = out.transpose(0, 3, 4, 1, 5, 2).reshape(N, Cout, Hout, Wout)
    return out


def _reference(x, weight, bias, *, stride=2, padding=1, output_padding=1):
    """Pure-JAX reference of the same forward pass (for validation)."""
    Cin, Cout, K, _ = weight.shape
    s, p, op = stride, padding, output_padding
    pb, pa = K - 1 - p, K - 1 - p + op
    w_conv = jnp.transpose(weight[:, :, ::-1, ::-1], (1, 0, 2, 3))  # (Cout, Cin, K, K)
    y = lax.conv_general_dilated(
        x, w_conv, window_strides=(1, 1),
        padding=[(pb, pa), (pb, pa)],
        lhs_dilation=(s, s),
        dimension_numbers=("NCHW", "OIHW", "NCHW"))
    y = y + bias.reshape(1, -1, 1, 1)
    mean = jnp.mean(y, axis=(2, 3), keepdims=True)
    var = jnp.mean((y - mean) ** 2, axis=(2, 3), keepdims=True)
    y = (y - mean) * lax.rsqrt(var + EPS)
    return jnp.maximum(y, 0.0)


if __name__ == "__main__":
    # Small deterministic setup: batch=2, in_channels=4, out_channels=8, 16x16 spatial.
    N, Cin, Cout, H, W, K = 2, 4, 8, 16, 16, 3

    key = jax.random.PRNGKey(0)
    kx, kw, kb = jax.random.split(key, 3)
    x = jax.random.normal(kx, (N, Cin, H, W), dtype=jnp.float32)

    fan = Cin * K * K
    bound = 1.0 / (fan ** 0.5)
    weight = jax.random.uniform(kw, (Cin, Cout, K, K), jnp.float32, -bound, bound)
    bias = jax.random.uniform(kb, (Cout,), jnp.float32, -bound, bound)

    fwd = jax.jit(conv_t_norm_relu)
    out = jax.block_until_ready(fwd(x, weight, bias))
    assert out.shape == (N, Cout, 2 * H, 2 * W), out.shape

    # Tight check: reference evaluated on the same bf16-rounded matmul inputs
    # (the kernel intentionally quantizes x / weight to bf16 for HBM traffic).
    x_q = x.astype(jnp.bfloat16).astype(jnp.float32)
    w_q = weight.astype(jnp.bfloat16).astype(jnp.float32)
    ref_q = jax.block_until_ready(_reference(x_q, w_q, bias))
    err_q = float(jnp.max(jnp.abs(out - ref_q)))
    assert jnp.allclose(out, ref_q, atol=1e-3, rtol=1e-3), err_q

    # Loose sanity check against the full-precision reference (bf16 input quantization).
    ref = jax.block_until_ready(_reference(x, weight, bias))
    err = float(jnp.max(jnp.abs(out - ref)))
    assert jnp.allclose(out, ref, atol=1e-1, rtol=1e-1), err

    print("KERNEL_OK")
</pallas_src>

<mosaic_0001>
module attributes {stable_mosaic.version = 11 : i64} {
  func.func @_convt_norm_relu_kernel(%arg0: i32, %arg1: i32, %arg2: memref<1x4x256xbf16, #tpu.memory_space<vmem>>, %arg3: memref<9x8x4xbf16, #tpu.memory_space<vmem>>, %arg4: memref<8x1xf32, #tpu.memory_space<vmem>>, %arg5: memref<1x4x8x256xf32, #tpu.memory_space<vmem>>) attributes {dimension_semantics = [#tpu.dimension_semantics<parallel>, #tpu.dimension_semantics<parallel>], iteration_bounds = array<i64: 2, 1>, scalar_prefetch = 0 : i64, scratch_operands = 0 : i64, tpu.core_type = #tpu.core_type<tc>, window_params = [{transform_indices = @transform_0, window_bounds = array<i64: 1, 4, 256>}, {transform_indices = @transform_1, window_bounds = array<i64: 9, 8, 4>}, {transform_indices = @transform_2, window_bounds = array<i64: 8, 1>}, {transform_indices = @transform_3, window_bounds = array<i64: 1, 4, 8, 256>}]} {
    %c0 = arith.constant 0 : index
    %c0_0 = arith.constant 0 : index
    %c0_1 = arith.constant 0 : index
    %0 = vector.load %arg2[%c0, %c0_0, %c0_1] : memref<1x4x256xbf16, #tpu.memory_space<vmem>>, vector<1x4x256xbf16>
    %1 = vector.shape_cast %0 : vector<1x4x256xbf16> to vector<4x256xbf16>
    %2 = tpu.iota {dimensions = array<i32: 1>} : vector<1x256xi32>
    %c16_i32 = arith.constant 16 : i32
    %c0_i32 = arith.constant 0 : i32
    %3 = arith.cmpi eq, %c16_i32, %c0_i32 : i32
    %c1_i32 = arith.constant 1 : i32
    %4 = arith.select %3, %c1_i32, %c16_i32 : i32
    %5 = vector.broadcast %4 : i32 to vector<1x256xi32>
    %6 = arith.remsi %2, %5 : vector<1x256xi32>
    %c0_i32_2 = arith.constant 0 : i32
    %7 = vector.broadcast %c0_i32_2 : i32 to vector<1x256xi32>
    %8 = arith.cmpi ne, %6, %7 : vector<1x256xi32>
    %c0_i32_3 = arith.constant 0 : i32
    %9 = vector.broadcast %c0_i32_3 : i32 to vector<1x256xi32>
    %10 = arith.cmpi slt, %6, %9 : vector<1x256xi32>
    %c0_i32_4 = arith.constant 0 : i32
    %11 = arith.cmpi slt, %4, %c0_i32_4 : i32
    %12 = vector.broadcast %11 : i1 to vector<1x256xi1>
    %13 = vector.broadcast %12 : vector<1x256xi1> to vector<1x256xi1>
    %14 = arith.xori %10, %13 : vector<1x256xi1>
    %15 = arith.andi %14, %8 : vector<1x256xi1>
    %16 = vector.broadcast %4 : i32 to vector<1x256xi32>
    %17 = arith.addi %6, %16 : vector<1x256xi32>
    %18 = arith.select %15, %17, %6 : vector<1x256xi1>, vector<1x256xi32>
    %c15_i32 = arith.constant 15 : i32
    %19 = vector.broadcast %c15_i32 : i32 to vector<1x256xi32>
    %20 = arith.cmpi ne, %18, %19 : vector<1x256xi32>
    %21 = vector.extract_strided_slice %1 {offsets = [0, 1], sizes = [4, 255], strides = [1, 1]} : vector<4x256xbf16> to vector<4x255xbf16>
    %cst = arith.constant 0.000000e+00 : bf16
    %22 = vector.broadcast %cst : bf16 to vector<4x1xbf16>
    %23 = tpu.concatenate %21, %22 in 1 : vector<4x255xbf16>, vector<4x1xbf16> -> vector<4x256xbf16>
    %cst_5 = arith.constant 0.000000e+00 : bf16
    %24 = vector.shape_cast %20 : vector<1x256xi1> to vector<1x256xi1>
    %25 = vector.broadcast %24 : vector<1x256xi1> to vector<4x256xi1>
    %26 = vector.broadcast %cst_5 : bf16 to vector<4x256xbf16>
    %27 = arith.select %25, %23, %26 : vector<4x256xi1>, vector<4x256xbf16>
    %28 = vector.extract_strided_slice %1 {offsets = [0, 16], sizes = [4, 240], strides = [1, 1]} : vector<4x256xbf16> to vector<4x240xbf16>
    %cst_6 = arith.constant 0.000000e+00 : bf16
    %29 = vector.broadcast %cst_6 : bf16 to vector<4x16xbf16>
    %30 = tpu.concatenate %28, %29 in 1 : vector<4x240xbf16>, vector<4x16xbf16> -> vector<4x256xbf16>
    %31 = vector.extract_strided_slice %1 {offsets = [0, 17], sizes = [4, 239], strides = [1, 1]} : vector<4x256xbf16> to vector<4x239xbf16>
    %cst_7 = arith.constant 0.000000e+00 : bf16
    %32 = vector.broadcast %cst_7 : bf16 to vector<4x17xbf16>
    %33 = tpu.concatenate %31, %32 in 1 : vector<4x239xbf16>, vector<4x17xbf16> -> vector<4x256xbf16>
    %cst_8 = arith.constant 0.000000e+00 : bf16
    %34 = vector.shape_cast %20 : vector<1x256xi1> to vector<1x256xi1>
    %35 = vector.broadcast %34 : vector<1x256xi1> to vector<4x256xi1>
    %36 = vector.broadcast %cst_8 : bf16 to vector<4x256xbf16>
    %37 = arith.select %35, %33, %36 : vector<4x256xi1>, vector<4x256xbf16>
    %c0_9 = arith.constant 0 : index
    %c0_10 = arith.constant 0 : index
    %38 = vector.load %arg4[%c0_9, %c0_10] : memref<8x1xf32, #tpu.memory_space<vmem>>, vector<8x1xf32>
    %c4 = arith.constant 4 : index
    %c0_11 = arith.constant 0 : index
    %c0_12 = arith.constant 0 : index
    %39 = vector.load %arg3[%c4, %c0_11, %c0_12] : memref<9x8x4xbf16, #tpu.memory_space<vmem>>, vector<1x8x4xbf16>
    %40 = vector.shape_cast %39 : vector<1x8x4xbf16> to vector<8x4xbf16>
    %cst_13 = arith.constant dense<0.000000e+00> : vector<8x256xf32>
    %41 = tpu.matmul %40, %1, %cst_13 {dimension_numbers = #tpu.dot_dimension_numbers<[1], [0], [0], [1], [0, 0, 1, 1], [], []>} : vector<8x4xbf16>, vector<4x256xbf16>, vector<8x256xf32> -> vector<8x256xf32>
    %42 = vector.broadcast %38 : vector<8x1xf32> to vector<8x256xf32>
    %43 = arith.addf %41, %42 : vector<8x256xf32>
    %c5 = arith.constant 5 : index
    %c0_14 = arith.constant 0 : index
    %c0_15 = arith.constant 0 : index
    %44 = vector.load %arg3[%c5, %c0_14, %c0_15] : memref<9x8x4xbf16, #tpu.memory_space<vmem>>, vector<1x8x4xbf16>
    %45 = vector.shape_cast %44 : vector<1x8x4xbf16> to vector<8x4xbf16>
    %cst_16 = arith.constant dense<0.000000e+00> : vector<8x256xf32>
    %46 = tpu.matmul %45, %1, %cst_16 {dimension_numbers = #tpu.dot_dimension_numbers<[1], [0], [0], [1], [0, 0, 1, 1], [], []>} : vector<8x4xbf16>, vector<4x256xbf16>, vector<8x256xf32> -> vector<8x256xf32>
    %c3 = arith.constant 3 : index
    %c0_17 = arith.constant 0 : index
    %c0_18 = arith.constant 0 : index
    %47 = vector.load %arg3[%c3, %c0_17, %c0_18] : memref<9x8x4xbf16, #tpu.memory_space<vmem>>, vector<1x8x4xbf16>
    %48 = vector.shape_cast %47 : vector<1x8x4xbf16> to vector<8x4xbf16>
    %cst_19 = arith.constant dense<0.000000e+00> : vector<8x256xf32>
    %49 = tpu.matmul %48, %27, %cst_19 {dimension_numbers = #tpu.dot_dimension_numbers<[1], [0], [0], [1], [0, 0, 1, 1], [], []>} : vector<8x4xbf16>, vector<4x256xbf16>, vector<8x256xf32> -> vector<8x256xf32>
    %50 = arith.addf %46, %49 : vector<8x256xf32>
    %51 = vector.broadcast %38 : vector<8x1xf32> to vector<8x256xf32>
    %52 = arith.addf %50, %51 : vector<8x256xf32>
    %c7 = arith.constant 7 : index
    %c0_20 = arith.constant 0 : index
    %c0_21 = arith.constant 0 : index
    %53 = vector.load %arg3[%c7, %c0_20, %c0_21] : memref<9x8x4xbf16, #tpu.memory_space<vmem>>, vector<1x8x4xbf16>
    %54 = vector.shape_cast %53 : vector<1x8x4xbf16> to vector<8x4xbf16>
    %cst_22 = arith.constant dense<0.000000e+00> : vector<8x256xf32>
    %55 = tpu.matmul %54, %1, %cst_22 {dimension_numbers = #tpu.dot_dimension_numbers<[1], [0], [0], [1], [0, 0, 1, 1], [], []>} : vector<8x4xbf16>, vector<4x256xbf16>, vector<8x256xf32> -> vector<8x256xf32>
    %c1 = arith.constant 1 : index
    %c0_23 = arith.constant 0 : index
    %c0_24 = arith.constant 0 : index
    %56 = vector.load %arg3[%c1, %c0_23, %c0_24] : memref<9x8x4xbf16, #tpu.memory_space<vmem>>, vector<1x8x4xbf16>
    %57 = vector.shape_cast %56 : vector<1x8x4xbf16> to vector<8x4xbf16>
    %cst_25 = arith.constant dense<0.000000e+00> : vector<8x256xf32>
    %58 = tpu.matmul %57, %30, %cst_25 {dimension_numbers = #tpu.dot_dimension_numbers<[1], [0], [0], [1], [0, 0, 1, 1], [], []>} : vector<8x4xbf16>, vector<4x256xbf16>, vector<8x256xf32> -> vector<8x256xf32>
    %59 = arith.addf %55, %58 : vector<8x256xf32>
    %60 = vector.broadcast %38 : vector<8x1xf32> to vector<8x256xf32>
    %61 = arith.addf %59, %60 : vector<8x256xf32>
    %c8 = arith.constant 8 : index
    %c0_26 = arith.constant 0 : index
    %c0_27 = arith.constant 0 : index
    %62 = vector.load %arg3[%c8, %c0_26, %c0_27] : memref<9x8x4xbf16, #tpu.memory_space<vmem>>, vector<1x8x4xbf16>
    %63 = vector.shape_cast %62 : vector<1x8x4xbf16> to vector<8x4xbf16>
    %cst_28 = arith.constant dense<0.000000e+00> : vector<8x256xf32>
    %64 = tpu.matmul %63, %1, %cst_28 {dimension_numbers = #tpu.dot_dimension_numbers<[1], [0], [0], [1], [0, 0, 1, 1], [], []>} : vector<8x4xbf16>, vector<4x256xbf16>, vector<8x256xf32> -> vector<8x256xf32>
    %c6 = arith.constant 6 : index
    %c0_29 = arith.constant 0 : index
    %c0_30 = arith.constant 0 : index
    %65 = vector.load %arg3[%c6, %c0_29, %c0_30] : memref<9x8x4xbf16, #tpu.memory_space<vmem>>, vector<1x8x4xbf16>
    %66 = vector.shape_cast %65 : vector<1x8x4xbf16> to vector<8x4xbf16>
    %cst_31 = arith.constant dense<0.000000e+00> : vector<8x256xf32>
    %67 = tpu.matmul %66, %27, %cst_31 {dimension_numbers = #tpu.dot_dimension_numbers<[1], [0], [0], [1], [0, 0, 1, 1], [], []>} : vector<8x4xbf16>, vector<4x256xbf16>, vector<8x256xf32> -> vector<8x256xf32>
    %68 = arith.addf %64, %67 : vector<8x256xf32>
    %c2 = arith.constant 2 : index
    %c0_32 = arith.constant 0 : index
    %c0_33 = arith.constant 0 : index
    %69 = vector.load %arg3[%c2, %c0_32, %c0_33] : memref<9x8x4xbf16, #tpu.memory_space<vmem>>, vector<1x8x4xbf16>
    %70 = vector.shape_cast %69 : vector<1x8x4xbf16> to vector<8x4xbf16>
    %cst_34 = arith.constant dense<0.000000e+00> : vector<8x256xf32>
    %71 = tpu.matmul %70, %30, %cst_34 {dimension_numbers = #tpu.dot_dimension_numbers<[1], [0], [0], [1], [0, 0, 1, 1], [], []>} : vector<8x4xbf16>, vector<4x256xbf16>, vector<8x256xf32> -> vector<8x256xf32>
    %72 = arith.addf %68, %71 : vector<8x256xf32>
    %c0_35 = arith.constant 0 : index
    %c0_36 = arith.constant 0 : index
    %c0_37 = arith.constant 0 : index
    %73 = vector.load %arg3[%c0_35, %c0_36, %c0_37] : memref<9x8x4xbf16, #tpu.memory_space<vmem>>, vector<1x8x4xbf16>
    %74 = vector.shape_cast %73 : vector<1x8x4xbf16> to vector<8x4xbf16>
    %cst_38 = arith.constant dense<0.000000e+00> : vector<8x256xf32>
    %75 = tpu.matmul %74, %37, %cst_38 {dimension_numbers = #tpu.dot_dimension_numbers<[1], [0], [0], [1], [0, 0, 1, 1], [], []>} : vector<8x4xbf16>, vector<4x256xbf16>, vector<8x256xf32> -> vector<8x256xf32>
    %76 = arith.addf %72, %75 : vector<8x256xf32>
    %77 = vector.broadcast %38 : vector<8x1xf32> to vector<8x256xf32>
    %78 = arith.addf %76, %77 : vector<8x256xf32>
    %cst_39 = arith.constant dense<0.000000e+00> : vector<8xf32>
    %79 = vector.multi_reduction <add>, %43, %cst_39 [1] : vector<8x256xf32> to vector<8xf32>
    %80 = vector.shape_cast %79 : vector<8xf32> to vector<8x1xf32>
    %cst_40 = arith.constant dense<0.000000e+00> : vector<8xf32>
    %81 = vector.multi_reduction <add>, %52, %cst_40 [1] : vector<8x256xf32> to vector<8xf32>
    %82 = vector.shape_cast %81 : vector<8xf32> to vector<8x1xf32>
    %83 = arith.addf %80, %82 : vector<8x1xf32>
    %cst_41 = arith.constant dense<0.000000e+00> : vector<8xf32>
    %84 = vector.multi_reduction <add>, %61, %cst_41 [1] : vector<8x256xf32> to vector<8xf32>
    %85 = vector.shape_cast %84 : vector<8xf32> to vector<8x1xf32>
    %86 = arith.addf %83, %85 : vector<8x1xf32>
    %cst_42 = arith.constant dense<0.000000e+00> : vector<8xf32>
    %87 = vector.multi_reduction <add>, %78, %cst_42 [1] : vector<8x256xf32> to vector<8xf32>
    %88 = vector.shape_cast %87 : vector<8xf32> to vector<8x1xf32>
    %89 = arith.addf %86, %88 : vector<8x1xf32>
    %cst_43 = arith.constant 1.024000e+03 : f32
    %90 = vector.broadcast %cst_43 : f32 to vector<8x1xf32>
    %91 = arith.divf %89, %90 : vector<8x1xf32>
    %92 = vector.broadcast %91 : vector<8x1xf32> to vector<8x256xf32>
    %93 = arith.subf %43, %92 : vector<8x256xf32>
    %94 = vector.broadcast %91 : vector<8x1xf32> to vector<8x256xf32>
    %95 = arith.subf %52, %94 : vector<8x256xf32>
    %96 = vector.broadcast %91 : vector<8x1xf32> to vector<8x256xf32>
    %97 = arith.subf %61, %96 : vector<8x256xf32>
    %98 = vector.broadcast %91 : vector<8x1xf32> to vector<8x256xf32>
    %99 = arith.subf %78, %98 : vector<8x256xf32>
    %100 = arith.mulf %93, %93 : vector<8x256xf32>
    %cst_44 = arith.constant dense<0.000000e+00> : vector<8xf32>
    %101 = vector.multi_reduction <add>, %100, %cst_44 [1] : vector<8x256xf32> to vector<8xf32>
    %102 = vector.shape_cast %101 : vector<8xf32> to vector<8x1xf32>
    %103 = arith.mulf %95, %95 : vector<8x256xf32>
    %cst_45 = arith.constant dense<0.000000e+00> : vector<8xf32>
    %104 = vector.multi_reduction <add>, %103, %cst_45 [1] : vector<8x256xf32> to vector<8xf32>
    %105 = vector.shape_cast %104 : vector<8xf32> to vector<8x1xf32>
    %106 = arith.addf %102, %105 : vector<8x1xf32>
    %107 = arith.mulf %97, %97 : vector<8x256xf32>
    %cst_46 = arith.constant dense<0.000000e+00> : vector<8xf32>
    %108 = vector.multi_reduction <add>, %107, %cst_46 [1] : vector<8x256xf32> to vector<8xf32>
    %109 = vector.shape_cast %108 : vector<8xf32> to vector<8x1xf32>
    %110 = arith.addf %106, %109 : vector<8x1xf32>
    %111 = arith.mulf %99, %99 : vector<8x256xf32>
    %cst_47 = arith.constant dense<0.000000e+00> : vector<8xf32>
    %112 = vector.multi_reduction <add>, %111, %cst_47 [1] : vector<8x256xf32> to vector<8xf32>
    %113 = vector.shape_cast %112 : vector<8xf32> to vector<8x1xf32>
    %114 = arith.addf %110, %113 : vector<8x1xf32>
    %cst_48 = arith.constant 1.024000e+03 : f32
    %115 = vector.broadcast %cst_48 : f32 to vector<8x1xf32>
    %116 = arith.divf %114, %115 : vector<8x1xf32>
    %cst_49 = arith.constant 9.99999974E-6 : f32
    %117 = vector.broadcast %cst_49 : f32 to vector<8x1xf32>
    %118 = arith.addf %116, %117 : vector<8x1xf32>
    %119 = math.rsqrt %118 : vector<8x1xf32>
    %120 = vector.broadcast %119 : vector<8x1xf32> to vector<8x256xf32>
    %121 = arith.mulf %93, %120 : vector<8x256xf32>
    %cst_50 = arith.constant 0.000000e+00 : f32
    %122 = vector.broadcast %cst_50 : f32 to vector<8x256xf32>
    %123 = arith.maximumf %121, %122 : vector<8x256xf32>
    %c0_51 = arith.constant 0 : index
    %c0_52 = arith.constant 0 : index
    %c0_53 = arith.constant 0 : index
    %c0_54 = arith.constant 0 : index
    %124 = vector.load %arg5[%c0_51, %c0_52, %c0_53, %c0_54] : memref<1x4x8x256xf32, #tpu.memory_space<vmem>>, vector<1x1x8x256xf32>
    %125 = vector.shape_cast %124 : vector<1x1x8x256xf32> to vector<8x256xf32>
    %126 = vector.shape_cast %123 : vector<8x256xf32> to vector<1x1x8x256xf32>
    tpu.vector_store %arg5[%c0_51, %c0_52, %c0_53, %c0_54], %126 {strides = array<i32>} : memref<1x4x8x256xf32, #tpu.memory_space<vmem>>, vector<1x1x8x256xf32>,
    %127 = vector.broadcast %119 : vector<8x1xf32> to vector<8x256xf32>
    %128 = arith.mulf %95, %127 : vector<8x256xf32>
    %cst_55 = arith.constant 0.000000e+00 : f32
    %129 = vector.broadcast %cst_55 : f32 to vector<8x256xf32>
    %130 = arith.maximumf %128, %129 : vector<8x256xf32>
    %c0_56 = arith.constant 0 : index
    %c1_57 = arith.constant 1 : index
    %c0_58 = arith.constant 0 : index
    %c0_59 = arith.constant 0 : index
    %131 = vector.load %arg5[%c0_56, %c1_57, %c0_58, %c0_59] : memref<1x4x8x256xf32, #tpu.memory_space<vmem>>, vector<1x1x8x256xf32>
    %132 = vector.shape_cast %131 : vector<1x1x8x256xf32> to vector<8x256xf32>
    %133 = vector.shape_cast %130 : vector<8x256xf32> to vector<1x1x8x256xf32>
    tpu.vector_store %arg5[%c0_56, %c1_57, %c0_58, %c0_59], %133 {strides = array<i32>} : memref<1x4x8x256xf32, #tpu.memory_space<vmem>>, vector<1x1x8x256xf32>,
    %134 = vector.broadcast %119 : vector<8x1xf32> to vector<8x256xf32>
    %135 = arith.mulf %97, %134 : vector<8x256xf32>
    %cst_60 = arith.constant 0.000000e+00 : f32
    %136 = vector.broadcast %cst_60 : f32 to vector<8x256xf32>
    %137 = arith.maximumf %135, %136 : vector<8x256xf32>
    %c0_61 = arith.constant 0 : index
    %c2_62 = arith.constant 2 : index
    %c0_63 = arith.constant 0 : index
    %c0_64 = arith.constant 0 : index
    %138 = vector.load %arg5[%c0_61, %c2_62, %c0_63, %c0_64] : memref<1x4x8x256xf32, #tpu.memory_space<vmem>>, vector<1x1x8x256xf32>
    %139 = vector.shape_cast %138 : vector<1x1x8x256xf32> to vector<8x256xf32>
    %140 = vector.shape_cast %137 : vector<8x256xf32> to vector<1x1x8x256xf32>
    tpu.vector_store %arg5[%c0_61, %c2_62, %c0_63, %c0_64], %140 {strides = array<i32>} : memref<1x4x8x256xf32, #tpu.memory_space<vmem>>, vector<1x1x8x256xf32>,
    %141 = vector.broadcast %119 : vector<8x1xf32> to vector<8x256xf32>
    %142 = arith.mulf %99, %141 : vector<8x256xf32>
    %cst_65 = arith.constant 0.000000e+00 : f32
    %143 = vector.broadcast %cst_65 : f32 to vector<8x256xf32>
    %144 = arith.maximumf %142, %143 : vector<8x256xf32>
    %c0_66 = arith.constant 0 : index
    %c3_67 = arith.constant 3 : index
    %c0_68 = arith.constant 0 : index
    %c0_69 = arith.constant 0 : index
    %145 = vector.load %arg5[%c0_66, %c3_67, %c0_68, %c0_69] : memref<1x4x8x256xf32, #tpu.memory_space<vmem>>, vector<1x1x8x256xf32>
    %146 = vector.shape_cast %145 : vector<1x1x8x256xf32> to vector<8x256xf32>
    %147 = vector.shape_cast %144 : vector<8x256xf32> to vector<1x1x8x256xf32>
    tpu.vector_store %arg5[%c0_66, %c3_67, %c0_68, %c0_69], %147 {strides = array<i32>} : memref<1x4x8x256xf32, #tpu.memory_space<vmem>>, vector<1x1x8x256xf32>,
    return
  }
  func.func @transform_0(%arg0: i32, %arg1: i32) -> (i32, i32, i32) {
    %c0_i32 = arith.constant 0 : i32
    %c0_i32_0 = arith.constant 0 : i32
    %c0_i32_1 = arith.constant 0 : i32
    return %arg0, %c0_i32, %c0_i32_0 : i32, i32, i32
  }
  func.func @transform_1(%arg0: i32, %arg1: i32) -> (i32, i32, i32) {
    %c0_i32 = arith.constant 0 : i32
    %c0_i32_0 = arith.constant 0 : i32
    %c0_i32_1 = arith.constant 0 : i32
    return %c0_i32, %arg1, %c0_i32_0 : i32, i32, i32
  }
  func.func @transform_2(%arg0: i32, %arg1: i32) -> (i32, i32) {
    %c0_i32 = arith.constant 0 : i32
    %c0_i32_0 = arith.constant 0 : i32
    return %arg1, %c0_i32 : i32, i32
  }
  func.func @transform_3(%arg0: i32, %arg1: i32) -> (i32, i32, i32, i32) {
    %c0_i32 = arith.constant 0 : i32
    %c0_i32_0 = arith.constant 0 : i32
    %c0_i32_1 = arith.constant 0 : i32
    return %arg0, %c0_i32, %arg1, %c0_i32_0 : i32, i32, i32, i32
  }
}

</mosaic_0001>

<bundles_post_ra>
// kernel: conv_t_norm_relu.1
= control target key start
LH: loop header
LB: loop body
LE: loop exit
PB: predicated region body
PF: predicated region fallthrough
CT: control target
= control target key end

     0   :  { %s1012_s12 = smov 0   ;;  %s1014_s13 = smov 0   ;;  %s1135_s0 = inlined_call_operand.vmem [shape: bf16[2,4,256], index: 0, kind: input, shape index: {}]   ;;  %s1136_s1 = inlined_call_operand.vmem [shape: bf16[9,8,4], index: 1, kind: input, shape index: {}]   ;;  %s1137_s2 = inlined_call_operand.vmem [shape: f32[8,1], index: 2, kind: input, shape index: {}]   ;;  %s1138_s3 = inlined_call_operand.vmem [shape: f32[2,4,8,256], index: 3, kind: output, shape index: {}]  }
   0x1   :  { %s1016_s14 = smov 0  }
   0x2 LB: > { %s25_s15 = sadd.s32 1, %s981_s13  ;;  %p888_p0 = scmp.ge.s32.totalorder %s985_s14, 1  ;;  %s985_s14 = sphi %s1016_s14, %s13_s14   ;;  %s981_s13 = sphi %s1014_s13, %s1144_s13   ;;  %s977_s12 = sphi %s1012_s12, %s1143_s12  }
   0x3   : > { %p27_p1 = scmp.ge.s32.totalorder %s25_s15, 2  ;;  %p169_p2 = scmp.lt.s32.totalorder %s985_s14, 3 }
   0x5   : > { %s1146_s15 = smov (%p27_p1, %s25_s15), 0  ;;  %p170_p3 = pnand %p888_p0, %p169_p2 }
   0x6   : > { %p205_p4 = scmp.lt.s32.totalorder (!%p170_p3), %s977_s12, 1  ;;  %s987_s20 = smov (!%p170_p3), 127  }
   0x7   : > { %173 = sbr.rel (%p170_p3) target bundleno = 629 (0x275), region = 32  ;;  %s988_s21 = smov (!%p170_p3), 112  }
   0x8   : > { %s989_s22 = smov (!%p170_p3), 111  }
   0xc   : > { %s1148_s12 = smov (!%p205_p4, %s977_s12), 1  ;;  %vm349_vm0 = vcmask 1041408   ;;  %v893_v11 = vld [vmem:[%s1136_s1 + $0x10] sm:$0xf]  ;;  %vm345_vm1 = vcmask 31744   ;;  %v231_v12 = vlaneseq  ;;  %v990_v13 = vmov 0  }
   0xd   : > { %s927_s16 = sshll.u32 %s1148_s12, 2  ;;  %958 = vset.pattern.permute.xlu0 %v990_v13  ;;  %v896_v22 = vld [vmem:[%s1136_s1 + $0x14] sm:$0xf]  ;;  %v334_v23 = vld [vmem:[%s1137_s2] sm:$0xff]  ;;  %v288_v33 = vunpack.c.l.b16 %v990_v13  ;;  %v289_v34 = vunpack.c.h.b16 %v990_v13  ;;  %v902_v35 = vld [vmem:[%s1136_s1 + $0x1c] sm:$0xf] }
   0xe   : > { %s209_s19 = scalar_lea.vmem %s1135_s0, %s927_s16  ;;  %v232_v14 = vand.u32 127, %v231_v12  ;;  %vm270_vm9 = vcmask 1039360   ;;  %v897_v54 = vld [vmem:[%s1136_s1 + $0xc] sm:$0xf]  ;;  %vm311_vm12 = vcmask 916480   ;;  %vm325_vm13 = vcmask 908288  }
   0xf   : > { %v230_v0 = vld [vmem:[%s209_s19] sm:$0xf] }
  0x10   : > { %261 = vst [vmem:[#allocation1] ss:$4 sm:$0xff] %v230_v0  ;;  %v233_v19 = vadd.s32 128, %v232_v14  ;;  %v238_v20 = vand.u32 15, %v232_v14  ;;  %v908_v56 = vld [vmem:[%s1136_s1 + $0x20] sm:$0xf] }
  0x12   : > { %v245_v21 = vand.u32 15, %v233_v19  ;;  %vm258_vm2 = vcmp.ne.s32.totalorder %v238_v20, 15 }
  0x14   : > { %vm259_vm3 = vcmp.ne.s32.totalorder %v245_v21, 15 }
  0x15   : > { %vm282_vm4 = vmpackc.low %vm259_vm3, %vm258_vm2 }
  0x16   : > { %v283_v28 = vsel %vm282_vm4, 65537, %v990_v13 }
  0x17   : > { %v262_v1 = vld.sshfl [vmem:[#allocation1] sm:$0xff pattern:$0x73625140]  ;;  %v264_v2 = vld.sshfl [vmem:[#allocation1 + $0x8] sm:$0xff pattern:$0x73625140] }
  0x18   : > { %266 = vrot.lane.b32.xlu0 %v262_v1, %s987_s20  ;;  %302 = vst [vmem:[#allocation1] ss:$4 sm:$0xff] %v230_v0  ;;  %v284_v29 = vperm.slane %v283_v28, 0  ;;  %v285_v30 = vperm.slane %v283_v28, 4 }
  0x1a   : > { %v286_v31 = vunpack.c.l.b16 %v284_v29  ;;  %v287_v32 = vunpack.c.h.b16 %v284_v29  ;;  %v293_v37 = vunpack.c.l.b16 %v285_v30  ;;  %v294_v38 = vunpack.c.h.b16 %v285_v30 }
  0x1c   : > { %vm290_vm5 = vcmp.ne.s32.totalorder %v286_v31, %v288_v33  ;;  %vm291_vm6 = vcmp.ne.s32.totalorder %v287_v32, %v289_v34  ;;  %vm297_vm7 = vcmp.ne.s32.totalorder %v293_v37, %v288_v33  ;;  %vm298_vm8 = vcmp.ne.s32.totalorder %v294_v38, %v289_v34 }
  0x1d   : > { %vm1062_vm10 = vmpackc.low %vm291_vm6, %vm290_vm5 }
  0x1e   : > { %vm1066_vm11 = vmpackc.low %vm298_vm8, %vm297_vm7 }
  0x1f   : > { %v303_v3 = vld.sshfl [vmem:[#allocation1] sm:$0xff pattern:$0x73625140]  ;;  %v305_v4 = vld.sshfl [vmem:[#allocation1 + $0x8] sm:$0xff pattern:$0x73625140] }
  0x20   : > { %268 = vrot.lane.b32.xlu0 %v264_v2, %s987_s20  ;;  %307 = vrot.lane.b32.xlu1 %v303_v3, %s988_s21  ;;  %316 = vst [vmem:[#allocation1] ss:$4 sm:$0xff] %v230_v0  ;;  %s928_s20 = sshll.u32 %s1148_s12, 6 }
  0x21   : > { %s226_s23 = scalar_lea.vmem %s1138_s3, %s928_s20 }
  0x27   : > { %v317_v5 = vld.sshfl [vmem:[#allocation1] sm:$0xff pattern:$0x73625140]  ;;  %v319_v6 = vld.sshfl [vmem:[#allocation1 + $0x8] sm:$0xff pattern:$0x73625140] }
  0x28   : > { %309 = vrot.lane.b32.xlu1 %v305_v4, %s988_s21  ;;  %321 = vrot.lane.b32.xlu2 %v317_v5, %s989_s22  ;;  %342 = vst [vmem:[#allocation1] ss:$4 sm:$0xff] %v230_v0  ;;  %v903_v4 = vld [vmem:[%s1136_s1 + $0x4] sm:$0xf]  ;;  %v635_v5 = vld [vmem:[%s1136_s1] sm:$0xf] }
  0x29   : > { %339 = vperm.xlu0 %958, %v334_v23  }
  0x2f   : > { %v343_v7 = vld.sshfl [vmem:[#allocation1] sm:$0xff pattern:$0x73625140]  ;;  %v344_v9 = vld.sshfl [vmem:[#allocation1 + $0x8] sm:$0xff pattern:$0x73625140] }
  0x30   : > { %323 = vrot.lane.b32.xlu2 %v319_v6, %s989_s22  ;;  %v350_v8 = vsel %vm349_vm0, %v343_v7, 0  ;;  %v352_v10 = vsel %vm349_vm0, %v344_v9, 0  ;;  %419 = vst [vmem:[#allocation1] ss:$4 sm:$0xff] %v230_v0  ;;  %v909_v6 = vld [vmem:[%s1136_s1 + $0x18] sm:$0xf] }
  0x31   : > { %361 = vmatpush.bf16.msra.mxu0 %v350_v8  ;;  %374 = vmatpush.bf16.msra.mxu1 %v352_v10  ;;  %v914_v7 = vld [vmem:[%s1136_s1 + $0x8] sm:$0xf] }
  0x34   : > { %894 = vmatmul.msk.bf16.vlgmr.msra.gmra.mxu0 %vm345_vm1, %v893_v11  ;;  %895 = vmatmul.msk.bf16.vlgmr.msra.gmra.mxu1 %vm345_vm1, %v893_v11 }
  0x37   : > { %v420_v15 = vld.sshfl [vmem:[#allocation1] sm:$0xff pattern:$0x73625140]  ;;  %v421_v16 = vld.sshfl [vmem:[#allocation1 + $0x8] sm:$0xff pattern:$0x73625140] }
  0x38   : > { %v425_v17 = vsel %vm349_vm0, %v420_v15, 0  ;;  %v427_v18 = vsel %vm349_vm0, %v421_v16, 0  ;;  %495 = vst [vmem:[#allocation1] ss:$4 sm:$0xff] %v230_v0 }
  0x39   : > { %436 = vmatpush.bf16.msrb.mxu0 %v425_v17  ;;  %449 = vmatpush.bf16.msrb.mxu1 %v427_v18 }
  0x3f   : > { %v496_v24 = vld.sshfl [vmem:[#allocation1] sm:$0xff pattern:$0x73625140]  ;;  %v497_v25 = vld.sshfl [vmem:[#allocation1 + $0x8] sm:$0xff pattern:$0x73625140] }
  0x40   : > { %v501_v26 = vsel %vm349_vm0, %v496_v24, 0  ;;  %v503_v27 = vsel %vm349_vm0, %v497_v25, 0  ;;  %566 = vst [vmem:[#allocation1] ss:$4 sm:$0xff] %v230_v0 }
  0x41   : > { %512 = vmatpush.bf16.msra.mxu0 %v501_v26  ;;  %525 = vmatpush.bf16.msra.mxu1 %v503_v27 }
  0x44   : > { %900 = vmatmul.msk.bf16.vlgmr.msrb.gmra.mxu0 %vm345_vm1, %v896_v22  ;;  %901 = vmatmul.msk.bf16.vlgmr.msrb.gmra.mxu1 %vm345_vm1, %v896_v22 }
  0x47   : > { %v567_v39 = vld.sshfl [vmem:[#allocation1] sm:$0xff pattern:$0x73625140]  ;;  %v568_v40 = vld.sshfl [vmem:[#allocation1 + $0x8] sm:$0xff pattern:$0x73625140] }
  0x48   : > { %v572_v41 = vsel %vm349_vm0, %v567_v39, 0  ;;  %v574_v42 = vsel %vm349_vm0, %v568_v40, 0 }
  0x49   : > { %583 = vmatpush.bf16.msrb.mxu0 %v572_v41  ;;  %596 = vmatpush.bf16.msrb.mxu1 %v574_v42 }
  0x54   : > { %906 = vmatmul.msk.bf16.vlgmr.msra.gmra.mxu0 %vm345_vm1, %v902_v35  ;;  %907 = vmatmul.msk.bf16.vlgmr.msra.gmra.mxu1 %vm345_vm1, %v902_v35 }
  0x64   : > { %912 = vmatmul.msk.bf16.vlgmr.msrb.gmra.mxu0 %vm345_vm1, %v908_v56  ;;  %913 = vmatmul.msk.bf16.vlgmr.msrb.gmra.mxu1 %vm345_vm1, %v908_v56 }
  0x82   : > { %v322_v43 = vpop.permute.xlu2 %321 }
  0x8a   : > { %v267_v36 = vpop.permute.xlu0 %266  ;;  %v324_v55 = vpop.permute.xlu2 %323 }
  0x8b   : > { %v326_v58 = vsel %vm325_vm13, %v322_v43, %v324_v55  ;;  %v330_v59 = vsel %vm325_vm13, %v324_v55, 0 }
  0x8c   : > { %v332_v62 = vsel %vm1062_vm10, %v326_v58, 0  ;;  %v333_v63 = vsel %vm1066_vm11, %v330_v59, 0 }
  0x8d   : > { %v640_v2 = vsel %vm349_vm0, %v332_v62, 0  ;;  %v643_v3 = vsel %vm349_vm0, %v333_v63, 0 }
  0x8e   : > { %652 = vmatpush.bf16.msra.mxu0 %v640_v2  ;;  %665 = vmatpush.bf16.msra.mxu1 %v643_v3  ;;  %v991_v3 = vmov 1024.0  }
  0x8f   : > { %959 = vrcp.f32 %v991_v3 }
  0x91   : > { %917 = vmatmul.msk.bf16.vlgmr.msra.gmra.mxu0 %vm345_vm1, %v635_v5  ;;  %918 = vmatmul.msk.bf16.vlgmr.msra.gmra.mxu1 %vm345_vm1, %v635_v5 }
  0x92   : > { %v269_v46 = vpop.permute.xlu0 %268  ;;  %v308_v47 = vpop.permute.xlu1 %307 }
  0x93   : > { %v271_v48 = vsel %vm270_vm9, %v267_v36, %v269_v46  ;;  %v276_v49 = vsel %vm270_vm9, %v269_v46, 0 }
  0x94   : > { %v300_v50 = vsel %vm1062_vm10, %v271_v48, 0  ;;  %v301_v51 = vsel %vm1066_vm11, %v276_v49, 0 }
  0x95   : > { %v388_v52 = vsel %vm349_vm0, %v300_v50, 0  ;;  %v391_v53 = vsel %vm349_vm0, %v301_v51, 0 }
  0x96   : > { %400 = vmatpush.bf16.msra.mxu2 %v388_v52  ;;  %413 = vmatpush.bf16.msra.mxu3 %v391_v53 }
  0x99   : > { %898 = vmatmul.msk.bf16.vlgmr.msra.gmra.mxu2 %vm345_vm1, %v897_v54  ;;  %899 = vmatmul.msk.bf16.vlgmr.msra.gmra.mxu3 %vm345_vm1, %v897_v54 }
  0x9a   : > { %v310_v57 = vpop.permute.xlu1 %309 }
  0x9b   : > { %v312_v60 = vsel %vm311_vm12, %v308_v47, %v310_v57  ;;  %v315_v61 = vsel %vm311_vm12, %v310_v57, 0  ;;  %v340_v10 = vpop.permute.xlu0 %339 }
  0x9c   : > { %v465_v0 = vsel %vm349_vm0, %v312_v60, 0  ;;  %v467_v1 = vsel %vm349_vm0, %v315_v61, 0 }
  0x9d   : > { %476 = vmatpush.bf16.msrb.mxu2 %v465_v0  ;;  %489 = vmatpush.bf16.msrb.mxu3 %v467_v1 }
  0xa1   : > { %547 = vmatpush.bf16.msra.mxu2 %v388_v52  ;;  %560 = vmatpush.bf16.msra.mxu3 %v391_v53 }
  0xa9   : > { %904 = vmatmul.msk.bf16.vlgmr.msrb.gmra.mxu2 %vm345_vm1, %v903_v4  ;;  %905 = vmatmul.msk.bf16.vlgmr.msrb.gmra.mxu3 %vm345_vm1, %v903_v4  ;;  %v960_v4 = vpop.eup %959 }
  0xaa   : > { %614 = vmatpush.bf16.msrb.mxu2 %v465_v0  ;;  %627 = vmatpush.bf16.msrb.mxu3 %v467_v1  ;;  %v691_v5 = vmul.f32 1024.0, %v960_v4  ;;  %vm695_vm14 = vweird.f32 %v960_v4 }
  0xb1   : > { %v363_v8 = vpop.f32.mrf.mxu0  ;;  %v376_v9 = vpop.f32.mrf.mxu1 }
  0xb2   : > { %v1114_v13 = vadd.f32 %v363_v8, %v340_v10  ;;  %v1116_v14 = vadd.f32 %v376_v9, %v340_v10 }
  0xb4   : > { %v675_v15 = vadd.f32 %v1116_v14, %v1114_v13 }
  0xb6   : > { %676 = vadd.xlane.f32.xlu1 %v675_v15 }
  0xb9   : > { %910 = vmatmul.msk.bf16.vlgmr.msra.gmra.mxu2 %vm345_vm1, %v909_v6  ;;  %911 = vmatmul.msk.bf16.vlgmr.msra.gmra.mxu3 %vm345_vm1, %v909_v6  ;;  %v365_v11 = vpop.f32.mrf.mxu0  ;;  %v378_v12 = vpop.f32.mrf.mxu1  ;;  %v692_v6 = vsub.f32 1.0, %v691_v5 }
  0xbb   : > { %v693_v8 = vmul.f32 %v960_v4, %v692_v6 }
  0xbd   : > { %v694_v12 = vadd.f32 %v960_v4, %v693_v8 }
  0xc1   : > { %v438_v16 = vpop.f32.mrf.mxu0  ;;  %v451_v17 = vpop.f32.mrf.mxu1 }
  0xc9   : > { %915 = vmatmul.msk.bf16.vlgmr.msrb.gmra.mxu2 %vm345_vm1, %v914_v7  ;;  %916 = vmatmul.msk.bf16.vlgmr.msrb.gmra.mxu3 %vm345_vm1, %v914_v7  ;;  %v440_v18 = vpop.f32.mrf.mxu0  ;;  %v453_v19 = vpop.f32.mrf.mxu1 }
  0xd1   : > { %v514_v20 = vpop.f32.mrf.mxu0  ;;  %v527_v21 = vpop.f32.mrf.mxu1 }
  0xd9   : > { %v516_v22 = vpop.f32.mrf.mxu0  ;;  %v529_v23 = vpop.f32.mrf.mxu1 }
  0xe1   : > { %v585_v24 = vpop.f32.mrf.mxu0  ;;  %v598_v25 = vpop.f32.mrf.mxu1 }
  0xe9   : > { %v587_v32 = vpop.f32.mrf.mxu0  ;;  %v600_v33 = vpop.f32.mrf.mxu1 }
 0x10e   : > { %v654_v37 = vpop.f32.mrf.mxu0  ;;  %v667_v38 = vpop.f32.mrf.mxu1 }
 0x116   : > { %v656_v45 = vpop.f32.mrf.mxu0  ;;  %v669_v46 = vpop.f32.mrf.mxu1 }
 0x11c   : > { %v402_v26 = vpop.f32.mrf.mxu2  ;;  %v415_v27 = vpop.f32.mrf.mxu3 }
 0x11d   : > { %v439_v28 = vadd.f32 %v438_v16, %v402_v26  ;;  %v452_v29 = vadd.f32 %v451_v17, %v415_v27  ;;  %v696_v17 = vsel %vm695_vm14, %v960_v4, %v694_v12 }
 0x11f   : > { %v455_v30 = vadd.f32 %v439_v28, %v340_v10  ;;  %v456_v31 = vadd.f32 %v452_v29, %v340_v10 }
 0x121   : > { %v678_v34 = vadd.f32 %v456_v31, %v455_v30 }
 0x123   : > { %679 = vadd.xlane.f32.xlu2 %v678_v34 }
 0x124   : > { %v404_v35 = vpop.f32.mrf.mxu2  ;;  %v417_v36 = vpop.f32.mrf.mxu3 }
 0x129   : > { %v677_v9 = vpop.xlane.xlu1 %676 }
 0x12c   : > { %v478_v39 = vpop.f32.mrf.mxu2  ;;  %v491_v40 = vpop.f32.mrf.mxu3 }
 0x12d   : > { %v515_v41 = vadd.f32 %v514_v20, %v478_v39  ;;  %v528_v42 = vadd.f32 %v527_v21, %v491_v40 }
 0x12f   : > { %v531_v43 = vadd.f32 %v515_v41, %v340_v10  ;;  %v532_v44 = vadd.f32 %v528_v42, %v340_v10 }
 0x131   : > { %v682_v47 = vadd.f32 %v532_v44, %v531_v43 }
 0x133   : > { %683 = vadd.xlane.f32.xlu0 %v682_v47 }
 0x134   : > { %v480_v48 = vpop.f32.mrf.mxu2  ;;  %v493_v49 = vpop.f32.mrf.mxu3 }
 0x13c   : > { %v549_v50 = vpop.f32.mrf.mxu2  ;;  %v562_v51 = vpop.f32.mrf.mxu3 }
 0x13d   : > { %v586_v54 = vadd.f32 %v585_v24, %v549_v50  ;;  %v599_v55 = vadd.f32 %v598_v25, %v562_v51 }
 0x144   : > { %v551_v52 = vpop.f32.mrf.mxu2  ;;  %v564_v53 = vpop.f32.mrf.mxu3 }
 0x14c   : > { %v616_v56 = vpop.f32.mrf.mxu2  ;;  %v629_v57 = vpop.f32.mrf.mxu3 }
 0x14d   : > { %v633_v58 = vadd.f32 %v616_v56, %v586_v54  ;;  %v634_v59 = vadd.f32 %v629_v57, %v599_v55 }
 0x14f   : > { %v671_v60 = vadd.f32 %v654_v37, %v633_v58  ;;  %v672_v61 = vadd.f32 %v667_v38, %v634_v59 }
 0x151   : > { %v673_v62 = vadd.f32 %v671_v60, %v340_v10  ;;  %v674_v63 = vadd.f32 %v672_v61, %v340_v10 }
 0x153   : > { %v686_v0 = vadd.f32 %v674_v63, %v673_v62 }
 0x154   : > { %v618_v1 = vpop.f32.mrf.mxu2  ;;  %v631_v2 = vpop.f32.mrf.mxu3 }
 0x155   : > { %687 = vadd.xlane.f32.xlu2 %v686_v0 }
 0x196   : > { %v680_v7 = vpop.xlane.xlu2 %679 }
 0x197   : > { %v681_v15 = vadd.f32 %v680_v7, %v677_v9 }
 0x1a6   : > { %v684_v11 = vpop.xlane.xlu0 %683 }
 0x1a7   : > { %v685_v16 = vadd.f32 %v684_v11, %v681_v15 }
 0x1c8   : > { %v688_v18 = vpop.xlane.xlu2 %687 }
 0x1c9   : > { %v689_v10 = vadd.f32 %v688_v18, %v685_v16 }
 0x1cb   : > { %v697_v19 = vmul.f32 %v696_v17, %v689_v10 }
 0x1cd   : > { %v700_v20 = vsub.f32 %v455_v30, %v697_v19  ;;  %v701_v21 = vsub.f32 %v456_v31, %v697_v19  ;;  %v698_v22 = vsub.f32 %v1114_v13, %v697_v19  ;;  %v699_v23 = vsub.f32 %v1116_v14, %v697_v19 }
 0x1ce   : > { %v704_v28 = vsub.f32 %v673_v62, %v697_v19  ;;  %v705_v29 = vsub.f32 %v674_v63, %v697_v19  ;;  %v702_v34 = vsub.f32 %v531_v43, %v697_v19  ;;  %v703_v35 = vsub.f32 %v532_v44, %v697_v19 }
 0x1cf   : > { %v711_v24 = vmul.f32 %v700_v20, %v700_v20  ;;  %v712_v25 = vmul.f32 %v701_v21, %v701_v21  ;;  %v706_v26 = vmul.f32 %v698_v22, %v698_v22  ;;  %v707_v27 = vmul.f32 %v699_v23, %v699_v23 }
 0x1d0   : > { %v723_v36 = vmul.f32 %v704_v28, %v704_v28  ;;  %v724_v37 = vmul.f32 %v705_v29, %v705_v29  ;;  %v717_v30 = vmul.f32 %v702_v34, %v702_v34  ;;  %v718_v31 = vmul.f32 %v703_v35, %v703_v35 }
 0x1d1   : > { %v713_v32 = vadd.f32 %v712_v25, %v711_v24  ;;  %v708_v33 = vadd.f32 %v707_v27, %v706_v26 }
 0x1d2   : > { %v725_v38 = vadd.f32 %v724_v37, %v723_v36  ;;  %v719_v13 = vadd.f32 %v718_v31, %v717_v30 }
 0x1d3   : > { %714 = vadd.xlane.f32.xlu2 %v713_v32  ;;  %709 = vadd.xlane.f32.xlu1 %v708_v33 }
 0x1db   : > { %726 = vadd.xlane.f32.xlu2 %v725_v38  ;;  %720 = vadd.xlane.f32.xlu1 %v719_v13 }
 0x246   : > { %v715_v14 = vpop.xlane.xlu2 %714  ;;  %v710_v39 = vpop.xlane.xlu1 %709 }
 0x247   : > { %v716_v40 = vadd.f32 %v715_v14, %v710_v39 }
 0x24e   : > { %v721_v41 = vpop.xlane.xlu1 %720  ;;  %v727_v45 = vpop.xlane.xlu2 %726 }
 0x24f   : > { %v722_v42 = vadd.f32 %v721_v41, %v716_v40 }
 0x251   : > { %v728_v46 = vadd.f32 %v727_v45, %v722_v42 }
 0x253   : > { %v729_v43 = vmul.f32 %v728_v46, %v696_v17 }
 0x255   : > { %v730_v44 = vadd.f32 1e-05, %v729_v43 }
 0x257   : > { %961 = vrsqrt.f32 %v730_v44  ;;  %vm737_vm0 = vweird.f32 %v730_v44 }
 0x25d   : > { %v962_v47 = vpop.eup %961 }
 0x25e   : > { %v732_v48 = vmul.f32 %v962_v47, %v730_v44  ;;  %vm738_vm15 = vweird.f32 %v962_v47 }
 0x25f   : > { %vm739_vm1 = vmor %vm737_vm0, %vm738_vm15 }
 0x260   : > { %v733_v49 = vmul.f32 %v962_v47, %v732_v48 }
 0x262   : > { %v734_v50 = vmul.f32 0.5, %v733_v49 }
 0x264   : > { %v735_v51 = vsub.f32 1.5, %v734_v50 }
 0x266   : > { %v736_v52 = vmul.f32 %v962_v47, %v735_v51 }
 0x268   : > { %v740_v53 = vsel %vm739_vm1, %v962_v47, %v736_v52 }
 0x269   : > { %v741_v54 = vmul.f32 %v740_v53, %v698_v22  ;;  %v742_v55 = vmul.f32 %v740_v53, %v699_v23  ;;  %v747_v56 = vmul.f32 %v740_v53, %v700_v20  ;;  %v748_v57 = vmul.f32 %v740_v53, %v701_v21 }
 0x26a   : > { %v754_v58 = vmul.f32 %v740_v53, %v702_v34  ;;  %v755_v59 = vmul.f32 %v740_v53, %v703_v35  ;;  %v761_v63 = vmul.f32 %v740_v53, %v704_v28  ;;  %v762_v1 = vmul.f32 %v740_v53, %v705_v29 }
 0x26b   : > { %v743_v60 = vmax.f32 %v741_v54, 0.0  ;;  %v744_v61 = vmax.f32 %v742_v55, 0.0  ;;  %v749_v62 = vmax.f32 %v747_v56, 0.0  ;;  %v750_v0 = vmax.f32 %v748_v57, 0.0 }
 0x26c   : > { %v756_v2 = vmax.f32 %v754_v58, 0.0  ;;  %v757_v3 = vmax.f32 %v755_v59, 0.0  ;;  %v763_v4 = vmax.f32 %v761_v63, 0.0  ;;  %v764_v5 = vmax.f32 %v762_v1, 0.0 }
 0x26d   : > { %745 = vst [vmem:[%s226_s23] sm:$0xff] %v743_v60 }
 0x26e   : > { %746 = vst [vmem:[%s226_s23 + $0x8] sm:$0xff] %v744_v61 }
 0x26f   : > { %919 = vst [vmem:[%s226_s23 + $0x10] sm:$0xff] %v749_v62 }
 0x270   : > { %920 = vst [vmem:[%s226_s23 + $0x18] sm:$0xff] %v750_v0 }
 0x271   : > { %921 = vst [vmem:[%s226_s23 + $0x20] sm:$0xff] %v756_v2 }
 0x272   : > { %922 = vst [vmem:[%s226_s23 + $0x28] sm:$0xff] %v757_v3 }
 0x273   : > { %923 = vst [vmem:[%s226_s23 + $0x30] sm:$0xff] %v763_v4 }
 0x274   : > { %924 = vst [vmem:[%s226_s23 + $0x38] sm:$0xff] %v764_v5 }
 0x275 PF: > { %s13_s14 = sadd.s32 1, %s985_s14   ;;  %s1143_s12 = smov %s981_s13 }
 0x276   : > { %p10_p5 = scmp.ge.s32.totalorder %s13_s14, 4   ;;  %s1144_s13 = smov %s1146_s15 }
 0x278   :  { %12 = sbr.rel (!%p10_p5) target bundleno = 2 (0x2), region = 79 }

</bundles_post_ra>
